<compile_context>
chip_gen: v5e
topology: v5e:2x2
jax: 0.10.0
libtpu: 0.0.40
codegen_flags: <defaults>
</compile_context>

<pallas_src>
from functools import partial

import jax
import jax.numpy as jnp
from jax import lax
from jax.experimental import pallas as pl
from jax.experimental.pallas import tpu as pltpu


# ---------------------------------------------------------------------------
# Kernel
# ---------------------------------------------------------------------------
def _fused_local_fc_kernel(x_ref, w_ref, b_ref, o_ref, *, apply_relu):
    # x_ref: (TB, K)  w_ref: (K, TN)  b_ref: (1, TN)  o_ref: (TB, TN)
    y = jnp.dot(x_ref[...], w_ref[...], preferred_element_type=jnp.float32)
    y = y + b_ref[...]                     # bias add in f32, pre-ReLU
    if apply_relu:
        y = jnp.maximum(y, 0.0)
    o_ref[...] = y.astype(o_ref.dtype)


# ---------------------------------------------------------------------------
# Parameter preparation (hoist out of the per-call path; cache the result)
# ---------------------------------------------------------------------------
def prepare_fused_params(weights, biases, compute_dtype=jnp.bfloat16):
    """weights: (stride, input_shape, output_shape); biases: (stride, output_shape).

    Returns (w_perm, b_perm) with
        w_perm[s*Ci + k, o*stride + s] = weights[s, k, o]     (block-diagonal)
        b_perm[0, o*stride + s]        = biases[s, o]
    so a single matmul lands directly in PyTorch's interleaved output order.
    """
    stride, input_shape, output_shape = weights.shape
    K = stride * input_shape
    N = output_shape * stride
    eye = jnp.eye(stride, dtype=weights.dtype)
    w_perm = jnp.einsum('sko,st->skot', weights, eye).reshape(K, N)
    w_perm = w_perm.astype(compute_dtype)
    b_perm = jnp.transpose(biases, (1, 0)).reshape(1, N).astype(jnp.float32)
    return w_perm, b_perm


# ---------------------------------------------------------------------------
# Tile selection (VMEM-budget aware, generation aware)
# ---------------------------------------------------------------------------
def _largest_divisor(dim, cap, aligns):
    """Largest divisor of `dim` that is <= cap and a multiple of one of `aligns`
    (tried in order).  Falls back to `dim` (full-extent block is always legal)."""
    cap = max(1, min(cap, dim))
    for align in aligns:
        d = (cap // align) * align
        while d >= align:
            if dim % d == 0:
                return d
            d -= align
    return dim


def _select_tiles(B, K, N, elt_in, elt_out, vmem_budget):
    sub = 16 if elt_in <= 2 else 8                      # sublane packing of x tile
    b_aligns = (16, 8, 1) if sub == 16 else (8, 1)

    # ---- Case A: whole (K, N) weight resident in VMEM; 1-D grid over B. ----
    w_bytes = 2 * (K * N * elt_in + N * 4)              # weight (x2 conservative) + bias
    per_row = 2 * (K * elt_in + N * elt_out)            # double-buffered x + out rows
    if w_bytes + per_row * sub <= vmem_budget:
        tb_cap = (vmem_budget - w_bytes) // per_row
        if B >= 2 * sub:
            tb_cap = min(tb_cap, B // 2)                # >=2 parallel steps (v7x: 2 TCs)
        tb_cap = min(tb_cap, 4096)
        TB = _largest_divisor(B, tb_cap, b_aligns)
        return TB, N

    # ---- Case B: weight too big -> tile N too (N will be the OUTER grid axis). ----
    tn_cap = max(128, (vmem_budget // 2) // max(1, 2 * K * elt_in))
    if N % 128 == 0 and N > 128:
        TN = _largest_divisor(N, tn_cap, (128,))
    else:
        TN = N                                          # sub-128 N: full-dim block (legal)
    rem = vmem_budget - 2 * (K * TN * elt_in + TN * 4)
    per_row = 2 * (K * elt_in + TN * elt_out)
    tb_cap = rem // per_row if rem > per_row * sub else sub
    tb_cap = min(max(tb_cap, sub), 2048)
    TB = _largest_divisor(B, tb_cap, b_aligns)
    return TB, TN


# ---------------------------------------------------------------------------
# Wrapper around pallas_call
# ---------------------------------------------------------------------------
def locally_feature_extraction_fused(x, w_perm, b_perm, *, stride, vector_shape,
                                     output_shape, has_activation=True,
                                     compute_dtype=jnp.bfloat16, out_dtype=None):
    """x: (B, vector_shape).  w_perm/b_perm from prepare_fused_params (cache them!).
    Returns (B, output_shape * stride) in the PyTorch module's interleaved order."""
    B = x.shape[0]
    input_shape = vector_shape // stride
    K = stride * input_shape
    N = output_shape * stride
    assert w_perm.shape == (K, N) and b_perm.shape == (1, N)

    compute_dtype = jnp.dtype(compute_dtype)
    out_dtype = jnp.dtype(out_dtype if out_dtype is not None else x.dtype)

    x_flat = x[:, :K].astype(compute_dtype)             # handles non-exact division
    w_perm = w_perm.astype(compute_dtype)

    elt_in = compute_dtype.itemsize
    elt_out = out_dtype.itemsize

    try:
        vmem_cap = int(pltpu.get_tpu_info().vmem_capacity_bytes)
    except Exception:
        vmem_cap = 64 << 20                              # conservative (v7x-sized) fallback
    vmem_budget = int(vmem_cap * 0.45)

    TB, TN = _select_tiles(B, K, N, elt_in, elt_out, vmem_budget)

    kernel = partial(_fused_local_fc_kernel, apply_relu=has_activation)

    if TN == N:
        # Weight resident: single (K, N) block, fetched once for the whole grid.
        grid = (pl.cdiv(B, TB),)
        in_specs = [
            pl.BlockSpec((TB, K), lambda i: (i, 0)),
            pl.BlockSpec((K, N), lambda i: (0, 0)),
            pl.BlockSpec((1, N), lambda i: (0, 0)),
        ]
        out_specs = pl.BlockSpec((TB, N), lambda i: (i, 0))
        dims = ("parallel",)
    else:
        # N OUTER, B INNER: the (K, TN) weight block index is constant across the
        # inner B loop, so it is not re-streamed from HBM per batch tile.
        grid = (pl.cdiv(N, TN), pl.cdiv(B, TB))
        in_specs = [
            pl.BlockSpec((TB, K), lambda j, i: (i, 0)),
            pl.BlockSpec((K, TN), lambda j, i: (0, j)),
            pl.BlockSpec((1, TN), lambda j, i: (0, j)),
        ]
        out_specs = pl.BlockSpec((TB, TN), lambda j, i: (i, j))
        dims = ("parallel", "parallel")

    footprint = 2 * (TB * K * elt_in + K * TN * elt_in + TN * 4 + TB * TN * elt_out)
    vmem_limit = int(min(0.9 * vmem_cap, max(1.5 * footprint, 32 << 20)))

    return pl.pallas_call(
        kernel,
        out_shape=jax.ShapeDtypeStruct((B, N), out_dtype),
        grid_spec=pltpu.PrefetchScalarGridSpec(
            num_scalar_prefetch=0,
            grid=grid,
            in_specs=in_specs,
            out_specs=out_specs,
        ),
        compiler_params=pltpu.CompilerParams(
            dimension_semantics=dims,
            vmem_limit_bytes=vmem_limit),
    )(x_flat, w_perm, b_perm)


def locally_feature_extraction(x, weights, biases, *, stride, vector_shape,
                               output_shape, has_activation=True,
                               compute_dtype=jnp.bfloat16):
    """Convenience wrapper.  For steady-state use, call prepare_fused_params()
    once, cache (w_perm, b_perm), and call locally_feature_extraction_fused."""
    w_perm, b_perm = prepare_fused_params(weights, biases, compute_dtype)
    return locally_feature_extraction_fused(
        x, w_perm, b_perm, stride=stride, vector_shape=vector_shape,
        output_shape=output_shape, has_activation=has_activation,
        compute_dtype=compute_dtype)


# ---------------------------------------------------------------------------
# Pure-JAX reference mirroring the PyTorch forward exactly
# ---------------------------------------------------------------------------
def _reference(x, weights, biases, *, stride, vector_shape, output_shape,
               has_activation=True):
    B = x.shape[0]
    input_shape = vector_shape // stride
    x = x[:, :stride * input_shape].reshape(B, stride, input_shape)
    outs = []
    for i in range(stride):
        y = jnp.dot(x[:, i, :], weights[i], precision=lax.Precision.HIGHEST)
        outs.append(y + biases[i])                          # (B, output_shape)
    x_out = jnp.stack(outs, axis=1)                         # (B, stride, output_shape)
    x_out = jnp.transpose(x_out, (0, 2, 1))                 # "Norm" == transpose only
    if has_activation:
        x_out = jnp.maximum(x_out, 0.0)
    return x_out.reshape(B, -1)


if __name__ == "__main__":
    # Small, deterministic example shapes (consistent with the module).
    B = 64
    stride = 4
    vector_shape = 64            # input_shape = 16
    output_shape = 32            # fused N = 128 (lane-dense output)
    input_shape = vector_shape // stride

    key = jax.random.PRNGKey(0)
    kx, kw, kb = jax.random.split(key, 3)

    x = jax.random.normal(kx, (B, vector_shape), dtype=jnp.float32)
    bound = 1.0 / (input_shape ** 0.5)      # nn.Linear-like init
    weights = jax.random.uniform(kw, (stride, input_shape, output_shape),
                                 jnp.float32, -bound, bound)
    biases = jax.random.uniform(kb, (stride, output_shape),
                                jnp.float32, -bound, bound)

    ref = _reference(x, weights, biases, stride=stride, vector_shape=vector_shape,
                     output_shape=output_shape, has_activation=True)

    # --- f32 compute path: tight tolerance ---
    w32, b32 = prepare_fused_params(weights, biases, compute_dtype=jnp.float32)
    out32 = locally_feature_extraction_fused(
        x, w32, b32, stride=stride, vector_shape=vector_shape,
        output_shape=output_shape, has_activation=True,
        compute_dtype=jnp.float32)
    out32 = jax.block_until_ready(out32)
    assert out32.shape == (B, output_shape * stride), out32.shape
    assert jnp.allclose(out32, ref, atol=1e-4, rtol=1e-4), "f32 path mismatch vs reference"

    # --- bf16 compute path (default, MXU-native): relaxed tolerance ---
    wbf, bbf = prepare_fused_params(weights, biases, compute_dtype=jnp.bfloat16)
    outbf = locally_feature_extraction_fused(
        x, wbf, bbf, stride=stride, vector_shape=vector_shape,
        output_shape=output_shape, has_activation=True,
        compute_dtype=jnp.bfloat16)
    outbf = jax.block_until_ready(outbf)
    assert outbf.shape == (B, output_shape * stride), outbf.shape
    assert jnp.allclose(outbf, ref, atol=5e-2, rtol=5e-2), "bf16 path mismatch vs reference"

    print("KERNEL_OK")
</pallas_src>

<mosaic_0001>
module attributes {stable_mosaic.version = 11 : i64} {
  func.func @_fused_local_fc_kernel(%arg0: i32, %arg1: memref<32x64xf32, #tpu.memory_space<vmem>>, %arg2: memref<64x128xf32, #tpu.memory_space<vmem>>, %arg3: memref<1x128xf32, #tpu.memory_space<vmem>>, %arg4: memref<32x128xf32, #tpu.memory_space<vmem>>) attributes {dimension_semantics = [#tpu.dimension_semantics<parallel>], iteration_bounds = array<i64: 2>, scalar_prefetch = 0 : i64, scratch_operands = 0 : i64, tpu.core_type = #tpu.core_type<tc>, window_params = [{transform_indices = @transform_0, window_bounds = array<i64: 32, 64>}, {pipeline_mode = #tpu.pipeline_mode<synchronous>, transform_indices = @transform_1, window_bounds = array<i64: 64, 128>}, {pipeline_mode = #tpu.pipeline_mode<synchronous>, transform_indices = @transform_2, window_bounds = array<i64: 1, 128>}, {transform_indices = @transform_3, window_bounds = array<i64: 32, 128>}]} {
    %c0 = arith.constant 0 : index
    %c0_0 = arith.constant 0 : index
    %0 = vector.load %arg1[%c0, %c0_0] : memref<32x64xf32, #tpu.memory_space<vmem>>, vector<32x64xf32>
    %c0_1 = arith.constant 0 : index
    %c0_2 = arith.constant 0 : index
    %1 = vector.load %arg2[%c0_1, %c0_2] : memref<64x128xf32, #tpu.memory_space<vmem>>, vector<64x128xf32>
    %cst = arith.constant dense<0.000000e+00> : vector<32x128xf32>
    %2 = tpu.matmul %0, %1, %cst {dimension_numbers = #tpu.dot_dimension_numbers<[1], [0], [0], [1], [0, 0, 1, 1], [], []>} : vector<32x64xf32>, vector<64x128xf32>, vector<32x128xf32> -> vector<32x128xf32>
    %c0_3 = arith.constant 0 : index
    %c0_4 = arith.constant 0 : index
    %3 = vector.load %arg3[%c0_3, %c0_4] : memref<1x128xf32, #tpu.memory_space<vmem>>, vector<1x128xf32>
    %4 = vector.broadcast %3 : vector<1x128xf32> to vector<32x128xf32>
    %5 = arith.addf %2, %4 : vector<32x128xf32>
    %cst_5 = arith.constant 0.000000e+00 : f32
    %6 = vector.broadcast %cst_5 : f32 to vector<32x128xf32>
    %7 = arith.maximumf %5, %6 : vector<32x128xf32>
    %c0_6 = arith.constant 0 : index
    %c0_7 = arith.constant 0 : index
    %8 = vector.load %arg4[%c0_6, %c0_7] : memref<32x128xf32, #tpu.memory_space<vmem>>, vector<32x128xf32>
    tpu.vector_store %arg4[%c0_6, %c0_7], %7 {strides = array<i32>} : memref<32x128xf32, #tpu.memory_space<vmem>>, vector<32x128xf32>,
    return
  }
  func.func @transform_0(%arg0: i32) -> (i32, i32) {
    %c0_i32 = arith.constant 0 : i32
    %c0_i32_0 = arith.constant 0 : i32
    return %arg0, %c0_i32 : i32, i32
  }
  func.func @transform_1(%arg0: i32) -> (i32, i32) {
    %c0_i32 = arith.constant 0 : i32
    %c0_i32_0 = arith.constant 0 : i32
    %c0_i32_1 = arith.constant 0 : i32
    return %c0_i32, %c0_i32_0 : i32, i32
  }
  func.func @transform_2(%arg0: i32) -> (i32, i32) {
    %c0_i32 = arith.constant 0 : i32
    %c0_i32_0 = arith.constant 0 : i32
    %c0_i32_1 = arith.constant 0 : i32
    return %c0_i32, %c0_i32_0 : i32, i32
  }
  func.func @transform_3(%arg0: i32) -> (i32, i32) {
    %c0_i32 = arith.constant 0 : i32
    %c0_i32_0 = arith.constant 0 : i32
    return %arg0, %c0_i32 : i32, i32
  }
}

</mosaic_0001>

<bundles_post_ra>
// kernel: tpu_custom_call.1
= control target key start
LH: loop header
LB: loop body
LE: loop exit
PB: predicated region body
PF: predicated region fallthrough
CT: control target
= control target key end

     0   :  { %8 = vsyncpa [#allocation3], 0  ;;  %s797_s0 = inlined_call_operand.hbm [shape: f32[64,64], index: 0, kind: input, shape index: {}]   ;;  %s798_s1 = inlined_call_operand.hbm [shape: f32[64,128], index: 1, kind: input, shape index: {}]   ;;  %s799_s2 = inlined_call_operand.vmem [shape: f32[1,128], index: 2, kind: input, shape index: {}]   ;;  %s800_s3 = inlined_call_operand.hbm [shape: f32[64,128], index: 3, kind: output, shape index: {}]  }
   0x1   :  { %10 = vsyncpa [#allocation3 + $0x1], 0 }
   0x2   :  { %11 = vsyncpa [#allocation6], 0 }
   0x3   :  { %12 = vsyncpa [#allocation4], 0 }
   0x4   :  { %14 = vsyncpa [#allocation4 + $0x1], 0  ;;  %s640_s12 = smov 0   ;;  %s642_s13 = smov 0  }
   0x5   :  { %s644_s14 = smov 0   ;;  %s646_s15 = smov 0  }
   0x6 LB: > { %s661_s16 = sadd.s32 4294967295, %s613_s15   ;;  %s375_s17 = sadd.s32 4294967294, %s613_s15   ;;  %s613_s15 = sphi %s646_s15, %s810_s15   ;;  %s609_s14 = sphi %s644_s14, %s809_s14   ;;  %s605_s13 = sphi %s642_s13, %s808_s13   ;;  %s601_s12 = sphi %s640_s12, %s807_s12  }
   0x7   : > { %p40_p0 = scmp.ne.s32.totalorder %s605_s13, %s601_s12  ;;  %p41_p1 = scmp.eq.s32.totalorder %s661_s16, 0 }
   0x8   : > { %p106_p2 = scmp.eq.s32.totalorder %s661_s16, 1  ;;  %p112_p3 = scmp.eq.s32.totalorder %s375_s17, 1 }
   0x9   : > { %p670_p4 = por %p41_p1, %p40_p0  ;;  %p376_p5 = scmp.ge.s32.totalorder %s613_s15, 1 }
   0xa   : > { %p675_p6 = por %p112_p3, %p40_p0  ;;  %p119_p7 = scmp.lt.s32.totalorder %s613_s15, 3 }
   0xb   : > { %s130_s22 = sshll.u32 %s798_s1, 4  ;;  %s615_s24 = smov [#allocation5]   ;;  %s131_s22 = int_to_ptr.hbm [resolvable:$true] %s130_s22 }
   0xc   : > { %p683_p8 = pnand %p376_p5, %p119_p7  ;;  %s132_s25 = sshll.u32 %s615_s24, 4  ;;  %s133_s25 = int_to_ptr.vmem [resolvable:$true] %s132_s25 }
   0xd   : > { %s693_s26 = sadd.s32 1, %s613_s15   ;;  %s616_s27 = smov 128  }
   0xe   : > { %p429_p9 = pneg %p683_p8  ;;  %s617_s28 = smov 8  }
   0xf   : > { %s24_s29 = ssub.s32 %s613_s15, %s693_s26  ;;  %s27_s30 = sadd.s32 1, %s609_s14 }
  0x10   : > { %p430_p10 = pnand %p429_p9, %p41_p1  ;;  %p25_p12 = scmp.eq.s32.totalorder %s24_s29, 0 }
  0x11   : > { %p34_p13 = scmp.ne.s32.totalorder %s609_s14, %s605_s13  ;;  %p35_p0 = scmp.eq.s32.totalorder %s613_s15, 0 }
  0x12   : > { %432 = dma.hbm_to_vmem [thread:$0]  (!%p430_p10), %s131_s22, 1024, %s133_s25, [#allocation6], %s616_s27, %s616_s27, %s617_s28  }
  0x13   : > { %s705_s4 = scalar_select %p25_p12, %s609_s14, %s27_s30  }
  0x14   : > { %p709_p3 = por %p106_p2, %p34_p13  ;;  %p442_p5 = scmp.lt.s32.totalorder %s613_s15, 2 }
  0x15   : > { %s149_s6 = sand.u32 1, %s609_s14   ;;  %s395_s7 = sshll.u32 %s613_s15, 5 }
  0x16   : > { %p36_p7 = por %p35_p0, %p34_p13  ;;  %s379_s8 = sshll.u32 %s149_s6, 5 }
  0x17   : > { %s158_s11 = scalar_lea.hbm %s797_s0, %s395_s7  ;;  %s153_s20 = scalar_lea.vmem [#allocation2], %s379_s8 }
  0x18   : > { %s159_s17 = sshll.u32 %s158_s11, 4  ;;  %s161_s21 = sshll.u32 %s153_s20, 4  ;;  %s160_s17 = int_to_ptr.hbm [resolvable:$true] %s159_s17  ;;  %s162_s21 = int_to_ptr.vmem [resolvable:$true] %s161_s21 }
  0x19   : > { %p719_p9 = pnand %p442_p5, %p36_p7  ;;  %s150_s24 = scalar_lea.sflag [#allocation3], %s149_s6 }
  0x1a   : > { %s513_s25 = sshra.s32 %s160_s17, 4  ;;  %s520_s8 = scalar_lea.hbm %s797_s0, 64  ;;  %s514_s25 = int_to_ptr.hbm [resolvable:$true] %s513_s25 }
  0x1b   : > { %s515_s29 = scalar_lea.hbm %s514_s25, 32  ;;  %p517_p10 = pneg %p719_p9 }
  0x1c   : > { %p516_p2 = scmp.ne.s32.totalorder %s514_s25, %s515_s29  ;;  %p521_p0 = scmp.lt.s32.totalorder %s514_s25, %s797_s0 }
  0x1d   : > { %p522_p5 = scmp.lt.s32.totalorder %s520_s8, %s515_s29 }
  0x1e   : > { %p518_p12 = pnand %p517_p10, %p516_p2 }
  0x1f   : > { %p523_p7 = por %p522_p5, %p521_p0 }
  0x20   : > { %p519_p13 = pneg %p518_p12 }
  0x22   : > { %p524_p11 = pnand %p523_p7, %p519_p13 }
  0x24   : > { %527 = shalt.err (!%p524_p11)
}
  0x25   : > { %436 = dma.hbm_to_vmem [thread:$0]  (!%p719_p9), %s160_s17, 512, %s162_s21, %s150_s24, %s616_s27, %s616_s27, %s617_s28  }
  0x26   : > { %173 = sbr.rel (%p683_p8) target bundleno = 203 (0xcb), region = 32  ;;  %s739_s6 = sand.u32 (!%p683_p8), 1, %s605_s13  }
  0x27   : > { %s383_s11 = sshll.u32 (!%p683_p8), %s739_s6, 5  ;;  %s176_s20 = scalar_lea.sflag (!%p683_p8), [#allocation3], %s739_s6 }
  0x28   : > { %s745_s25 = scalar_lea.vmem (!%p683_p8), [#allocation2], %s383_s11 }
  0x2b   : > { %588 = dma.done.wait (%p670_p4), %s176_s20, 512  }
  0x2c   : > { %590 = vsyncadd (%p670_p4), %s176_s20, 4294966784 }
  0x2d   : > { %592 = dma.done.wait (%p41_p1), [#allocation6], 1024  }
  0x2e   : > { %594 = vsyncadd (%p41_p1), [#allocation6], 4294966272  ;;  %v221_v0 = vld [vmem:[#allocation5 + $0x38] sm:$0xff]  ;;  %v220_v1 = vld [vmem:[#allocation5 + $0x30] sm:$0xff]  ;;  %vm226_vm0 = vcmask 523264   ;;  %s396_s27 = sshll.u32 %s661_s16, 5 }
  0x2f   : > { %398 = vmatpush.msra.mxu2 %v221_v0  ;;  %399 = vmatpush.msra.mxu3 %v221_v0  ;;  %v219_v2 = vld [vmem:[#allocation5 + $0x28] sm:$0xff]  ;;  %v218_v3 = vld [vmem:[#allocation5 + $0x20] sm:$0xff]  ;;  %v217_v4 = vld [vmem:[#allocation5 + $0x18] sm:$0xff]  ;;  %s288_s21 = scalar_lea.hbm %s800_s3, %s396_s27  ;;  %s207_s22 = scalar_lea.vmem [#allocation7], %s383_s11 }
  0x30   : > { %247 = vmatpush.msra.mxu0 %v221_v0  ;;  %397 = vmatpush.msra.mxu1 %v221_v0  ;;  %v216_v5 = vld [vmem:[#allocation5 + $0x10] sm:$0xff]  ;;  %v215_v6 = vld [vmem:[#allocation5 + $0x8] sm:$0xff]  ;;  %v214_v7 = vld [vmem:[#allocation5] sm:$0xff]  ;;  %s289_s24 = sshll.u32 %s207_s22, 4  ;;  %s291_s29 = sshll.u32 %s288_s21, 4  ;;  %s290_s24 = int_to_ptr.vmem [resolvable:$true] %s289_s24  ;;  %s292_s29 = int_to_ptr.hbm [resolvable:$true] %s291_s29 }
  0x31   : > { %401 = vmatpush.msra.mxu2 %v220_v1  ;;  %402 = vmatpush.msra.mxu3 %v220_v1  ;;  %v212_v8 = vld [vmem:[%s745_s25 + $0x10] sm:$0xff]  ;;  %v213_v9 = vld [vmem:[%s745_s25 + $0x18] sm:$0xff]  ;;  %v210_v10 = vld [vmem:[%s745_s25] sm:$0xff]  ;;  %s277_s16 = scalar_lea.sflag [#allocation4], %s739_s6  ;;  %s557_s30 = sshra.s32 %s292_s29, 4  ;;  %s558_s30 = int_to_ptr.hbm [resolvable:$true] %s557_s30 }
  0x32   : > { %248 = vmatpush.msra.mxu0 %v220_v1  ;;  %400 = vmatpush.msra.mxu1 %v220_v1  ;;  %v211_v11 = vld [vmem:[%s745_s25 + $0x8] sm:$0xff]  ;;  %v482_v12 = vld [vmem:[%s799_s2] ss:$0 sm:$0xff]  ;;  %s559_s7 = scalar_lea.hbm %s558_s30, 32  ;;  %s563_s10 = scalar_lea.hbm %s800_s3, 64 }
  0x33   : > { %404 = vmatpush.msra.mxu2 %v219_v2  ;;  %405 = vmatpush.msra.mxu3 %v219_v2  ;;  %p560_p1 = scmp.ne.s32.totalorder %s558_s30, %s559_s7  ;;  %p564_p11 = scmp.lt.s32.totalorder %s558_s30, %s800_s3 }
  0x34   : > { %249 = vmatpush.msra.mxu0 %v219_v2  ;;  %403 = vmatpush.msra.mxu1 %v219_v2  ;;  %p565_p9 = scmp.lt.s32.totalorder %s563_s10, %s559_s7 }
  0x35   : > { %407 = vmatpush.msra.mxu2 %v218_v3  ;;  %408 = vmatpush.msra.mxu3 %v218_v3  ;;  %p561_p4 = pnand %p560_p1, %p709_p3 }
  0x36   : > { %250 = vmatpush.msra.mxu0 %v218_v3  ;;  %406 = vmatpush.msra.mxu1 %v218_v3  ;;  %p566_p2 = por %p565_p9, %p564_p11 }
  0x37   : > { %410 = vmatpush.msra.mxu2 %v217_v4  ;;  %411 = vmatpush.msra.mxu3 %v217_v4  ;;  %p562_p8 = pneg %p561_p4 }
  0x38   : > { %251 = vmatpush.msra.mxu0 %v217_v4  ;;  %409 = vmatpush.msra.mxu1 %v217_v4 }
  0x39   : > { %413 = vmatpush.msra.mxu2 %v216_v5  ;;  %414 = vmatpush.msra.mxu3 %v216_v5  ;;  %p567_p10 = pnand %p566_p2, %p562_p8 }
  0x3a   : > { %252 = vmatpush.msra.mxu0 %v216_v5  ;;  %412 = vmatpush.msra.mxu1 %v216_v5 }
  0x3b   : > { %416 = vmatpush.msra.mxu2 %v215_v6  ;;  %417 = vmatpush.msra.mxu3 %v215_v6 }
  0x3c   : > { %253 = vmatpush.msra.mxu0 %v215_v6  ;;  %415 = vmatpush.msra.mxu1 %v215_v6 }
  0x3d   : > { %419 = vmatpush.msra.mxu2 %v214_v7  ;;  %420 = vmatpush.msra.mxu3 %v214_v7 }
  0x3e   : > { %388 = vmatmul.msk.f32.vlgmr.msra.gmra.mxu2 %vm226_vm0, %v212_v8  ;;  %389 = vmatmul.msk.f32.vlgmr.msra.gmra.mxu3 %vm226_vm0, %v213_v9 }
  0x3f   : > { %254 = vmatpush.msra.mxu0 %v214_v7  ;;  %418 = vmatpush.msra.mxu1 %v214_v7 }
  0x40   : > { %386 = vmatmul.msk.f32.vlgmr.msra.gmra.mxu0 %vm226_vm0, %v210_v10  ;;  %387 = vmatmul.msk.f32.vlgmr.msra.gmra.mxu1 %vm226_vm0, %v211_v11 }
  0xbd   : > { %v256_v13 = vpop.f32.mrf.mxu0  ;;  %v259_v14 = vpop.f32.mrf.mxu1 }
  0xbe   : > { %v257_v15 = vadd.f32 %v482_v12, %v256_v13  ;;  %v260_v16 = vadd.f32 %v482_v12, %v259_v14 }
  0xc0   : > { %v268_v17 = vmax.f32 %v257_v15, 0.0  ;;  %v269_v18 = vmax.f32 %v260_v16, 0.0 }
  0xc1   : > { %v262_v19 = vpop.f32.mrf.mxu2  ;;  %v265_v20 = vpop.f32.mrf.mxu3 }
  0xc2   : > { %272 = vst [vmem:[%s207_s22] sm:$0xff] %v268_v17  ;;  %v263_v21 = vadd.f32 %v482_v12, %v262_v19  ;;  %v266_v22 = vadd.f32 %v482_v12, %v265_v20 }
  0xc3   : > { %273 = vst [vmem:[%s207_s22 + $0x8] sm:$0xff] %v269_v18 }
  0xc4   : > { %v270_v23 = vmax.f32 %v263_v21, 0.0  ;;  %v271_v24 = vmax.f32 %v266_v22, 0.0 }
  0xc6   : > { %274 = vst [vmem:[%s207_s22 + $0x10] sm:$0xff] %v270_v23 }
  0xc7   : > { %275 = vst [vmem:[%s207_s22 + $0x18] sm:$0xff] %v271_v24 }
  0xc8   : > { %570 = shalt.err (!%p567_p10)
}
  0xc9   : > { %s618_s6 = smov 128   ;;  %s619_s25 = smov 8  }
  0xca   : > { %427 = dma.vmem_to_hbm [thread:$0]  (%p709_p3), %s290_s24, 512, %s292_s29, %s277_s16, %s618_s6, %s618_s6, %s619_s25  }
  0xcb PF: > { %s306_s18 = sand.u32 1, %s601_s12   ;;  %p806_p12 = scmp.ge.s32.totalorder %s613_s15, 2 }
  0xcc   : > { %s307_s23 = scalar_lea.sflag [#allocation4], %s306_s18 }
  0xcd   : > { %p438_p13 = pnand %p806_p12, %p675_p6 }
  0xcf   : > { %p439_p0 = pneg %p438_p13 }
  0xd1   : > { %596 = dma.done.wait (%p439_p0), %s307_s23, 512  }
  0xd2   : > { %598 = vsyncadd (%p439_p0), %s307_s23, 4294966784  ;;  %p17_p5 = scmp.ge.s32.totalorder %s693_s26, 4   ;;  %s807_s12 = smov %s605_s13 }
  0xd3   : > { %s808_s13 = smov %s609_s14  ;;  %s809_s14 = smov %s705_s4 }
  0xd4   : > { %s810_s15 = smov %s693_s26  ;;  %19 = sbr.rel (!%p17_p5) target bundleno = 6 (0x6), region = 81 }
  0xd9   :  { %313 = vsyncpa [#allocation3], 1 }
  0xda   :  { %315 = vsyncpa [#allocation3 + $0x1], 1 }
  0xdb   :  { %316 = vsyncpa [#allocation6], 1 }
  0xdc   :  { %317 = vsyncpa [#allocation4], 1 }
  0xdd   :  { %319 = vsyncpa [#allocation4 + $0x1], 1 }

</bundles_post_ra>
